<compile_context>
chip_gen: v5e
topology: v5e:2x2
jax: 0.10.0
libtpu: 0.0.40
codegen_flags: <defaults>
</compile_context>

<pallas_src>
import functools

import jax
import jax.numpy as jnp
from jax.experimental import pallas as pl
from jax.experimental.pallas import tpu as pltpu


def _round_up(v, m):
    return ((v + m - 1) // m) * m


def _causal_conv1d_kernel(x_ref, halo_ref, w_ref, b_ref, o_ref, *, K, dilation, pad):
    # x_ref:    (1, TT, C_in)    current time tile
    # halo_ref: (1, HB, C_in)    rows immediately preceding this tile
    #                            (clamped/garbage for the first tile -> zeroed)
    # w_ref:    (K*C_in, C_out)  taps flattened as row = k*C_in + c
    # b_ref:    (1, C_out)       f32 bias
    # o_ref:    (1, TT, C_out)
    ti = pl.program_id(1)
    TT = o_ref.shape[1]
    HB = halo_ref.shape[1]

    x_tile = x_ref[0]                                       # (TT, C_in)
    if pad > 0:
        halo = halo_ref[0, HB - pad:, :]                    # (pad, C_in)
        # First time-tile: the halo is the causal left zero-padding.
        halo = halo * (ti > 0).astype(halo.dtype)
        x_full = jnp.concatenate([halo, x_tile], axis=0)    # (TT + pad, C_in)
    else:
        x_full = x_tile

    # im2col over the K taps -> a single deep-contraction MXU matmul.
    cols = [x_full[k * dilation: k * dilation + TT, :] for k in range(K)]
    x_col = cols[0] if K == 1 else jnp.concatenate(cols, axis=1)   # (TT, K*C_in)

    acc = jnp.dot(x_col, w_ref[...], preferred_element_type=jnp.float32)
    acc = acc + b_ref[...].astype(jnp.float32)              # (1, C_out) broadcast
    o_ref[0] = acc.astype(o_ref.dtype)


def causal_conv1d(x, weight, bias, *, dilation=1, compute_dtype=None, time_tile=None):
    """x: (B, T, C_in); weight: (C_out, C_in, K) [PyTorch layout]; bias: (C_out,)."""
    B, T, C_in = x.shape
    C_out, C_in_w, K = weight.shape
    assert C_in_w == C_in
    pad = (K - 1) * dilation
    out_dtype = x.dtype

    cdt = jnp.dtype(compute_dtype) if compute_dtype is not None else jnp.dtype(x.dtype)
    # Flatten taps: row k*C_in + c  <->  tap k, input channel c.
    wf = jnp.transpose(weight, (2, 1, 0)).reshape(K * C_in, C_out).astype(cdt)
    b2 = bias.reshape(1, C_out).astype(jnp.float32)
    xc = x.astype(cdt)

    # ---- time-tile selection ------------------------------------------------
    HB = _round_up(max(pad, 1), 8)                  # halo block rows (mult. of 8)
    if time_tile is not None:
        TT = _round_up(max(int(time_tile), 1), HB)
    else:
        TT = _round_up(min(T, 512), HB)

    in_bytes = cdt.itemsize
    out_bytes = jnp.dtype(out_dtype).itemsize

    def vmem_est(tt):
        return (2 * tt * C_in * in_bytes            # x tile (double buffered)
                + 2 * HB * C_in * in_bytes          # halo
                + 2 * K * C_in * C_out * in_bytes   # weights
                + 2 * tt * C_out * out_bytes        # output tile
                + tt * K * C_in * 4                 # im2col slab (f32 upper bound)
                + tt * C_out * 4)                   # f32 accumulator

    VMEM_BUDGET = 24 * 1024 * 1024                  # conservative across v5e/v6e/v7x
    while TT > HB and vmem_est(TT) > VMEM_BUDGET:
        TT = max(HB, (TT // 2) // HB * HB)

    # Pad T up to a multiple of TT only when needed (trailing zeros do not
    # affect causal outputs at t < T; padded rows are sliced off below).
    T_full = _round_up(T, TT)
    if T_full != T:
        xc = jnp.pad(xc, ((0, 0), (0, T_full - T), (0, 0)))
    NT = T_full // TT
    halo_blocks_per_tile = TT // HB

    in_specs = [
        pl.BlockSpec((1, TT, C_in), lambda b, i: (b, i, 0)),
        pl.BlockSpec((1, HB, C_in),
                     lambda b, i: (b, jnp.maximum(i * halo_blocks_per_tile - 1, 0), 0)),
        pl.BlockSpec((K * C_in, C_out), lambda b, i: (0, 0)),
        pl.BlockSpec((1, C_out), lambda b, i: (0, 0)),
    ]
    out_specs = pl.BlockSpec((1, TT, C_out), lambda b, i: (b, i, 0))

    flops = 2 * B * T * K * C_in * C_out
    bytes_accessed = int(xc.size) * in_bytes \
        + B * NT * HB * C_in * in_bytes \
        + int(wf.size) * in_bytes + int(b2.size) * 4 \
        + B * T_full * C_out * out_bytes

    kernel = functools.partial(_causal_conv1d_kernel, K=K, dilation=dilation, pad=pad)

    out = pl.pallas_call(
        kernel,
        out_shape=jax.ShapeDtypeStruct((B, T_full, C_out), out_dtype),
        grid_spec=pltpu.PrefetchScalarGridSpec(
            num_scalar_prefetch=0,
            grid=(B, NT),
            in_specs=in_specs,
            out_specs=out_specs,
        ),
        compiler_params=pltpu.CompilerParams(
            dimension_semantics=("parallel", "parallel"),
            vmem_limit_bytes=48 * 1024 * 1024,
        ),
        cost_estimate=pl.CostEstimate(
            flops=flops, transcendentals=0, bytes_accessed=bytes_accessed),
    )(xc, xc, wf, b2)

    if T_full != T:
        out = out[:, :T, :]
    return out


def _reference_causal_conv1d(x, weight, bias, *, dilation=1):
    """Plain-JAX reference matching the PyTorch module semantics."""
    B, T, C_in = x.shape
    C_out, _, K = weight.shape
    pad = (K - 1) * dilation
    x_pad = jnp.pad(x, ((0, 0), (pad, 0), (0, 0)))
    out = jnp.zeros((B, T, C_out), jnp.float32)
    for k in range(K):
        x_k = x_pad[:, k * dilation: k * dilation + T, :]           # (B, T, C_in)
        out = out + jnp.einsum("btc,oc->bto", x_k, weight[:, :, k],
                               precision=jax.lax.Precision.HIGHEST)
    return (out + bias[None, None, :]).astype(x.dtype)


def _make_params(key, in_channels, out_channels, kernel_size):
    kw, kb = jax.random.split(key)
    fan_in = in_channels * kernel_size
    bound = 1.0 / (fan_in ** 0.5)
    weight = jax.random.uniform(kw, (out_channels, in_channels, kernel_size),
                                minval=-bound, maxval=bound, dtype=jnp.float32)
    bias = jax.random.uniform(kb, (out_channels,),
                              minval=-bound, maxval=bound, dtype=jnp.float32)
    return weight, bias


if __name__ == "__main__":
    key = jax.random.PRNGKey(0)
    k1, k2, k3, k4 = jax.random.split(key, 4)

    # --- test 1: small shapes consistent with the module, single time tile, f32
    B, T, C_in, C_out, K, dil = 2, 16, 8, 8, 3, 2
    x = jax.random.normal(k1, (B, T, C_in), dtype=jnp.float32)
    w, b = _make_params(k2, C_in, C_out, K)
    out = jax.block_until_ready(causal_conv1d(x, w, b, dilation=dil))
    ref = _reference_causal_conv1d(x, w, b, dilation=dil)
    assert out.shape == (B, T, C_out)
    assert jnp.allclose(out, ref, atol=1e-4, rtol=1e-4)

    # --- test 2: multi-tile path (halo + trailing time pad exercised), f32
    B2, T2, C_in2, C_out2 = 2, 40, 8, 16
    x2 = jax.random.normal(k3, (B2, T2, C_in2), dtype=jnp.float32)
    w2, b2 = _make_params(k4, C_in2, C_out2, K)
    out2 = jax.block_until_ready(
        causal_conv1d(x2, w2, b2, dilation=dil, time_tile=16))
    ref2 = _reference_causal_conv1d(x2, w2, b2, dilation=dil)
    assert out2.shape == (B2, T2, C_out2)
    assert jnp.allclose(out2, ref2, atol=1e-4, rtol=1e-4)

    # --- test 3: bf16 compute dtype (halved HBM traffic), f32 accumulation
    out3 = jax.block_until_ready(
        causal_conv1d(x2, w2, b2, dilation=dil, time_tile=16,
                      compute_dtype=jnp.bfloat16))
    assert out3.shape == (B2, T2, C_out2)
    assert jnp.allclose(out3, ref2, atol=5e-2, rtol=5e-2)

    print("KERNEL_OK")
</pallas_src>

<mosaic_0001>
module attributes {stable_mosaic.version = 11 : i64} {
  func.func @_causal_conv1d_kernel(%arg0: i32, %arg1: i32, %arg2: memref<1x16x8xf32, #tpu.memory_space<vmem>>, %arg3: memref<1x8x8xf32, #tpu.memory_space<vmem>>, %arg4: memref<24x8xf32, #tpu.memory_space<vmem>>, %arg5: memref<1x8xf32, #tpu.memory_space<vmem>>, %arg6: memref<1x16x8xf32, #tpu.memory_space<vmem>>) attributes {dimension_semantics = [#tpu.dimension_semantics<parallel>, #tpu.dimension_semantics<parallel>], iteration_bounds = array<i64: 2, 1>, scalar_prefetch = 0 : i64, scratch_operands = 0 : i64, tpu.core_type = #tpu.core_type<tc>, window_params = [{transform_indices = @transform_0, window_bounds = array<i64: 1, 16, 8>}, {transform_indices = @transform_1, window_bounds = array<i64: 1, 8, 8>}, {pipeline_mode = #tpu.pipeline_mode<synchronous>, transform_indices = @transform_2, window_bounds = array<i64: 24, 8>}, {pipeline_mode = #tpu.pipeline_mode<synchronous>, transform_indices = @transform_3, window_bounds = array<i64: 1, 8>}, {transform_indices = @transform_4, window_bounds = array<i64: 1, 16, 8>}]} {
    %c0 = arith.constant 0 : index
    %c0_0 = arith.constant 0 : index
    %c0_1 = arith.constant 0 : index
    %0 = vector.load %arg2[%c0, %c0_0, %c0_1] : memref<1x16x8xf32, #tpu.memory_space<vmem>>, vector<1x16x8xf32>
    %1 = vector.shape_cast %0 : vector<1x16x8xf32> to vector<16x8xf32>
    %c0_2 = arith.constant 0 : index
    %c4 = arith.constant 4 : index
    %c0_3 = arith.constant 0 : index
    %2 = vector.load %arg3[%c0_2, %c4, %c0_3] : memref<1x8x8xf32, #tpu.memory_space<vmem>>, vector<1x4x8xf32>
    %3 = vector.shape_cast %2 : vector<1x4x8xf32> to vector<4x8xf32>
    %c0_i32 = arith.constant 0 : i32
    %4 = arith.cmpi sgt, %arg1, %c0_i32 : i32
    %5 = arith.extui %4 : i1 to i32
    %6 = arith.sitofp %5 : i32 to f32
    %7 = vector.broadcast %6 : f32 to vector<4x8xf32>
    %8 = arith.mulf %3, %7 : vector<4x8xf32>
    %9 = tpu.concatenate %8, %1 in 0 : vector<4x8xf32>, vector<16x8xf32> -> vector<20x8xf32>
    %10 = vector.extract_strided_slice %9 {offsets = [0, 0], sizes = [16, 8], strides = [1, 1]} : vector<20x8xf32> to vector<16x8xf32>
    %11 = vector.extract_strided_slice %9 {offsets = [2, 0], sizes = [16, 8], strides = [1, 1]} : vector<20x8xf32> to vector<16x8xf32>
    %12 = vector.extract_strided_slice %9 {offsets = [4, 0], sizes = [16, 8], strides = [1, 1]} : vector<20x8xf32> to vector<16x8xf32>
    %13 = tpu.concatenate %10, %11, %12 in 1 : vector<16x8xf32>, vector<16x8xf32>, vector<16x8xf32> -> vector<16x24xf32>
    %c0_4 = arith.constant 0 : index
    %c0_5 = arith.constant 0 : index
    %14 = vector.load %arg4[%c0_4, %c0_5] : memref<24x8xf32, #tpu.memory_space<vmem>>, vector<24x8xf32>
    %cst = arith.constant dense<0.000000e+00> : vector<16x8xf32>
    %15 = tpu.matmul %13, %14, %cst {dimension_numbers = #tpu.dot_dimension_numbers<[1], [0], [0], [1], [0, 0, 1, 1], [], []>} : vector<16x24xf32>, vector<24x8xf32>, vector<16x8xf32> -> vector<16x8xf32>
    %c0_6 = arith.constant 0 : index
    %c0_7 = arith.constant 0 : index
    %16 = vector.load %arg5[%c0_6, %c0_7] : memref<1x8xf32, #tpu.memory_space<vmem>>, vector<1x8xf32>
    %17 = vector.broadcast %16 : vector<1x8xf32> to vector<16x8xf32>
    %18 = arith.addf %15, %17 : vector<16x8xf32>
    %c0_8 = arith.constant 0 : index
    %c0_9 = arith.constant 0 : index
    %c0_10 = arith.constant 0 : index
    %19 = vector.load %arg6[%c0_8, %c0_9, %c0_10] : memref<1x16x8xf32, #tpu.memory_space<vmem>>, vector<1x16x8xf32>
    %20 = vector.shape_cast %19 : vector<1x16x8xf32> to vector<16x8xf32>
    %21 = vector.shape_cast %18 : vector<16x8xf32> to vector<1x16x8xf32>
    tpu.vector_store %arg6[%c0_8, %c0_9, %c0_10], %21 {strides = array<i32>} : memref<1x16x8xf32, #tpu.memory_space<vmem>>, vector<1x16x8xf32>,
    return
  }
  func.func @transform_0(%arg0: i32, %arg1: i32) -> (i32, i32, i32) {
    %c0_i32 = arith.constant 0 : i32
    %c0_i32_0 = arith.constant 0 : i32
    return %arg0, %arg1, %c0_i32 : i32, i32, i32
  }
  func.func @transform_1(%arg0: i32, %arg1: i32) -> (i32, i32, i32) {
    %c2_i32 = arith.constant 2 : i32
    %0 = arith.muli %arg1, %c2_i32 : i32
    %c1_i32 = arith.constant 1 : i32
    %1 = arith.subi %0, %c1_i32 : i32
    %c0_i32 = arith.constant 0 : i32
    %2 = arith.maxsi %1, %c0_i32 : i32
    %c0_i32_0 = arith.constant 0 : i32
    %c0_i32_1 = arith.constant 0 : i32
    return %arg0, %2, %c0_i32_0 : i32, i32, i32
  }
  func.func @transform_2(%arg0: i32, %arg1: i32) -> (i32, i32) {
    %c0_i32 = arith.constant 0 : i32
    %c0_i32_0 = arith.constant 0 : i32
    %c0_i32_1 = arith.constant 0 : i32
    return %c0_i32, %c0_i32_0 : i32, i32
  }
  func.func @transform_3(%arg0: i32, %arg1: i32) -> (i32, i32) {
    %c0_i32 = arith.constant 0 : i32
    %c0_i32_0 = arith.constant 0 : i32
    %c0_i32_1 = arith.constant 0 : i32
    return %c0_i32, %c0_i32_0 : i32, i32
  }
  func.func @transform_4(%arg0: i32, %arg1: i32) -> (i32, i32, i32) {
    %c0_i32 = arith.constant 0 : i32
    %c0_i32_0 = arith.constant 0 : i32
    return %arg0, %arg1, %c0_i32 : i32, i32, i32
  }
}

</mosaic_0001>

<bundles_post_ra>
// kernel: tpu_custom_call.1
= control target key start
LH: loop header
LB: loop body
LE: loop exit
PB: predicated region body
PF: predicated region fallthrough
CT: control target
= control target key end

     0   :  { %s586_s15 = smov 0   ;;  %s588_s16 = smov 0   ;;  %s647_s0 = inlined_call_operand.vmem [shape: f32[2,16,8], index: 0, kind: input, shape index: {}]   ;;  %s648_s1 = inlined_call_operand.vmem [shape: f32[2,16,8], index: 1, kind: input, shape index: {}]   ;;  %s649_s2 = inlined_call_operand.vmem [shape: f32[24,8], index: 2, kind: input, shape index: {}]   ;;  %s650_s3 = inlined_call_operand.vmem [shape: f32[1,8], index: 3, kind: input, shape index: {}]   ;;  %s651_s4 = inlined_call_operand.vmem [shape: f32[2,16,8], index: 4, kind: output, shape index: {}]  }
   0x1   :  { %s590_s17 = smov 0  }
   0x2 LB: > { %s26_s18 = sadd.s32 1, %s553_s16  ;;  %p491_p0 = scmp.ge.s32.totalorder %s557_s17, 1  ;;  %s557_s17 = sphi %s590_s17, %s14_s17   ;;  %s553_s16 = sphi %s588_s16, %s653_s16   ;;  %s549_s15 = sphi %s586_s15, %s652_s15  }
   0x3   : > { %p28_p1 = scmp.ge.s32.totalorder %s26_s18, 2  ;;  %p214_p2 = scmp.lt.s32.totalorder %s557_s17, 3 }
   0x5   : > { %s655_s18 = smov (%p28_p1, %s26_s18), 0  ;;  %p215_p3 = pnand %p491_p0, %p214_p2 }
   0x6   : > { %p261_p4 = scmp.lt.s32.totalorder (!%p215_p3), %s549_s15, 1  ;;  %s559_s30 = smov (!%p215_p3), 8  }
   0x7   : > { %218 = sbr.rel (%p215_p3) target bundleno = 277 (0x115), region = 36  ;;  %s560_s5 = smov (!%p215_p3), 16  }
   0xc   : > { %v345_v0 = vld [vmem:[%s649_s2 + $0x10] sm:$0xff]  ;;  %v344_v1 = vld [vmem:[%s649_s2 + $0x8] sm:$0xff]  ;;  %s657_s15 = smov (!%p261_p4, %s549_s15), 1  ;;  %vm306_vm0 = vcmask 1043456   ;;  %vm314_vm1 = vcmask 1045504   ;;  %v343_v20 = vld [vmem:[%s649_s2] sm:$0xff] }
   0xd   : > { %370 = vmatpush.msra.mxu0 %v345_v0  ;;  %505 = vmatpush.msra.mxu1 %v345_v0  ;;  %s610_s23 = sshll.u32 %s657_s15, 4  ;;  %vm337_vm2 = vcmask 64512   ;;  %vm340_vm3 = vcmask 130048   ;;  %vm350_vm4 = vcmask 195584   ;;  %v534_v29 = vld [vmem:[%s650_s3] ss:$0 sm:$0xff] }
   0xe   : > { %s268_s26 = scalar_lea.vmem %s647_s0, %s610_s23  ;;  %s281_s29 = scalar_lea.vmem %s648_s1, %s610_s23 }
   0xf   : > { %371 = vmatpush.msra.mxu0 %v344_v1  ;;  %506 = vmatpush.msra.mxu1 %v344_v1  ;;  %v296_v2 = vld [vmem:[%s268_s26] sm:$0xff]  ;;  %v297_v3 = vld [vmem:[%s268_s26 + $0x8] sm:$0xff]  ;;  %s294_s12 = scalar_lea.vmem %s651_s4, %s610_s23 }
  0x10   : > { %v298_v4 = vld [vmem:[%s281_s29 + $0x4] sm:$0xf]  ;;  %v307_v6 = vrot.slane %v296_v2, 4  ;;  %v308_v7 = vrot.slane %v297_v3, 4 }
  0x11   : > { %v303_v5 = vmul.f32 0.0, %v298_v4  ;;  %372 = vmatpush.msra.mxu0 %v343_v20  ;;  %507 = vmatpush.msra.mxu1 %v343_v20 }
  0x12   : > { %v309_v8 = vsel %vm306_vm0, %v307_v6, %v308_v7  ;;  %v318_v16 = vrot.slane %v308_v7, 2  ;;  %v329_v17 = vrot.slane %v308_v7, 4 }
  0x13   : > { %v312_v9 = vsel %vm306_vm0, %v303_v5, %v307_v6  ;;  %v316_v11 = vrot.slane %v309_v8, 2  ;;  %v327_v13 = vrot.slane %v309_v8, 4 }
  0x14   : > { %v315_v10 = vrot.slane %v312_v9, 2  ;;  %v326_v12 = vrot.slane %v312_v9, 4 }
  0x15   : > { %v319_v18 = vsel %vm314_vm1, %v316_v11, %v318_v16  ;;  %v330_v19 = vsel %vm306_vm0, %v327_v13, %v329_v17 }
  0x16   : > { %v317_v14 = vsel %vm314_vm1, %v315_v10, %v316_v11  ;;  %v328_v15 = vsel %vm306_vm0, %v326_v12, %v327_v13 }
  0x17   : > { %320 = vrot.lane.b32.xlu0 %v317_v14, %s559_s30  ;;  %331 = vrot.lane.b32.xlu1 %v328_v15, %s560_s5 }
  0x1f   : > { %322 = vrot.lane.b32.xlu0 %v319_v18, %s559_s30  ;;  %333 = vrot.lane.b32.xlu1 %v330_v19, %s560_s5 }
  0x89   : > { %v321_v21 = vpop.permute.xlu0 %320  ;;  %v332_v22 = vpop.permute.xlu1 %331 }
  0x8a   : > { %v338_v23 = vsel %vm337_vm2, %v312_v9, %v321_v21 }
  0x8b   : > { %v341_v24 = vsel %vm340_vm3, %v338_v23, %v332_v22 }
  0x8c   : > { %498 = vmatmul.msk.f32.vlgmr.msra.gmra.mxu0 %vm350_vm4, %v341_v24 }
  0x91   : > { %v323_v25 = vpop.permute.xlu0 %322  ;;  %v334_v26 = vpop.permute.xlu1 %333 }
  0x92   : > { %v339_v27 = vsel %vm337_vm2, %v309_v8, %v323_v25 }
  0x93   : > { %v342_v28 = vsel %vm340_vm3, %v339_v27, %v334_v26 }
  0x94   : > { %499 = vmatmul.msk.f32.vlgmr.msra.gmra.mxu1 %vm350_vm4, %v342_v28 }
 0x109   : > { %v374_v30 = vpop.f32.mrf.mxu0 }
 0x10a   : > { %v375_v31 = vadd.f32 %v534_v29, %v374_v30 }
 0x10c   : > { %380 = vst.msk [vmem:[%s294_s12] sm:$0xff] %vm337_vm2, %v375_v31 }
 0x111   : > { %v377_v32 = vpop.f32.mrf.mxu1 }
 0x112   : > { %v378_v33 = vadd.f32 %v534_v29, %v377_v32 }
 0x114   : > { %381 = vst.msk [vmem:[%s294_s12 + $0x8] sm:$0xff] %vm337_vm2, %v378_v33 }
 0x115 PF: > { %s14_s17 = sadd.s32 1, %s557_s17   ;;  %s652_s15 = smov %s553_s16 }
 0x116   : > { %p11_p5 = scmp.ge.s32.totalorder %s14_s17, 4   ;;  %s653_s16 = smov %s655_s18 }
 0x118   :  { %13 = sbr.rel (!%p11_p5) target bundleno = 2 (0x2), region = 69 }

</bundles_post_ra>
